<compile_context>
chip_gen: v5e
topology: v5e:2x2
jax: 0.10.0
libtpu: 0.0.40
codegen_flags: <defaults>
</compile_context>

<pallas_src>
import jax
import jax.numpy as jnp
from jax.experimental import pallas as pl
from jax.experimental.pallas import tpu as pltpu


def placement_mlp_kernel(x_ref, w1_ref, b1_ref, w2_ref, b2_ref,
                         w3_ref, b3_ref, w4_ref, b4_ref, o_ref):
    """Fused MLP in feature-major layout; activations are (features, TILE_B)."""
    cd = x_ref.dtype
    x = x_ref[...]                                            # (10, TB)

    # fc1 + ReLU   (dropout1 = identity in eval mode)
    h = jnp.dot(w1_ref[...], x, preferred_element_type=jnp.float32)
    h = jnp.maximum(h + b1_ref[...], 0.0).astype(cd)          # (128, TB)

    # fc2 + ReLU   (dropout2 = identity in eval mode)
    h = jnp.dot(w2_ref[...], h, preferred_element_type=jnp.float32)
    h = jnp.maximum(h + b2_ref[...], 0.0).astype(cd)          # (64, TB)

    # fc3 + ReLU   (dropout3 = identity in eval mode)
    h = jnp.dot(w3_ref[...], h, preferred_element_type=jnp.float32)
    h = jnp.maximum(h + b3_ref[...], 0.0)                     # (32, TB) f32

    # fc4: out_features == 1 -> VPU multiply + sublane reduce, lane-dense out.
    out = jnp.sum(h * w4_ref[...], axis=0, keepdims=True) + b4_ref[0, 0]
    o_ref[...] = out.astype(o_ref.dtype)                      # (1, TB)


def placement_nn_forward(x, params, *, tile_b=1024, compute_dtype=jnp.float32):
    """x: (B, 10) float32.  params from init_params.  Returns (B, 1) float32."""
    B = x.shape[0]

    # Feature-major operands: weights as (out, in), biases as (out, 1).
    w1t = params["w1"].T.astype(compute_dtype)   # (128, 10)
    w2t = params["w2"].T.astype(compute_dtype)   # (64, 128)
    w3t = params["w3"].T.astype(compute_dtype)   # (32, 64)
    b1 = params["b1"].T.astype(jnp.float32)      # (128, 1)
    b2 = params["b2"].T.astype(jnp.float32)      # (64, 1)
    b3 = params["b3"].T.astype(jnp.float32)      # (32, 1)
    w4 = params["w4"].astype(jnp.float32)        # (32, 1) column (VPU path)
    b4 = params["b4"].astype(jnp.float32)        # (1, 1) scalar -> SMEM

    xt = x.T.astype(compute_dtype)               # (10, B)

    if B <= tile_b:
        tb = B                                   # single grid step, full block
        b_pad = B
    else:
        tb = max(128, (tile_b // 128) * 128)     # lane-aligned tile
        b_pad = pl.cdiv(B, tb) * tb
        if b_pad != B:
            xt = jnp.pad(xt, ((0, 0), (0, b_pad - B)))

    grid = (b_pad // tb,)

    def resident(a):  # whole array, same block every grid step -> stays in VMEM
        return pl.BlockSpec(a.shape, lambda i: (0, 0))

    in_specs = [
        pl.BlockSpec((10, tb), lambda i: (0, i)),    # x tile (streamed / pipelined)
        resident(w1t), resident(b1),
        resident(w2t), resident(b2),
        resident(w3t), resident(b3),
        resident(w4),
        pl.BlockSpec(memory_space=pltpu.SMEM),       # b4 scalar
    ]
    out_spec = pl.BlockSpec((1, tb), lambda i: (0, i))

    out = pl.pallas_call(
        placement_mlp_kernel,
        out_shape=jax.ShapeDtypeStruct((1, b_pad), jnp.float32),
        grid=grid,
        in_specs=in_specs,
        out_specs=out_spec,
        compiler_params=pltpu.CompilerParams(
            dimension_semantics=("parallel",)),
    )(xt, w1t, b1, w2t, b2, w3t, b3, w4, b4)

    return out[0, :B].reshape(B, 1)


def init_params(key):
    """Deterministic init mimicking PyTorch nn.Linear default
    (uniform in +/- 1/sqrt(fan_in)).  Weights stored as (in, out)."""
    dims = [(10, 128), (128, 64), (64, 32), (32, 1)]
    params = {}
    keys = jax.random.split(key, 2 * len(dims))
    for i, (fin, fout) in enumerate(dims):
        bound = 1.0 / jnp.sqrt(fin)
        w = jax.random.uniform(keys[2 * i], (fin, fout), jnp.float32,
                               minval=-bound, maxval=bound)
        b = jax.random.uniform(keys[2 * i + 1], (1, fout), jnp.float32,
                               minval=-bound, maxval=bound)
        params[f"w{i + 1}"] = w
        params[f"b{i + 1}"] = b
    return params


def reference_forward(x, params):
    h = jnp.maximum(x @ params["w1"] + params["b1"], 0.0)
    h = jnp.maximum(h @ params["w2"] + params["b2"], 0.0)
    h = jnp.maximum(h @ params["w3"] + params["b3"], 0.0)
    return h @ params["w4"] + params["b4"]


if __name__ == "__main__":
    key = jax.random.PRNGKey(0)
    k_param, k_x = jax.random.split(key)
    params = init_params(k_param)

    # Small smoke test: single grid step, f32 compute, exact match.
    B = 8
    x = jax.random.normal(k_x, (B, 10), jnp.float32)
    out = jax.block_until_ready(placement_nn_forward(x, params))
    ref = reference_forward(x, params)
    assert out.shape == (B, 1), out.shape
    assert jnp.allclose(out, ref, atol=1e-5, rtol=1e-5), "f32 mismatch vs reference"

    # Tiled / padded path: multi-step batch grid, resident weights, bf16 compute.
    B2 = 300  # non-multiple of the tile to exercise padding + partial slice
    x2 = jax.random.normal(jax.random.PRNGKey(1), (B2, 10), jnp.float32)
    out2 = jax.block_until_ready(
        placement_nn_forward(x2, params, tile_b=128, compute_dtype=jnp.bfloat16))
    ref2 = reference_forward(x2, params)
    assert out2.shape == (B2, 1), out2.shape
    assert jnp.allclose(out2, ref2, atol=5e-2, rtol=5e-2), "bf16 mismatch vs reference"

    print("KERNEL_OK")
</pallas_src>

<mosaic_0001>
module attributes {stable_mosaic.version = 11 : i64} {
  func.func @placement_mlp_kernel(%arg0: i32, %arg1: memref<10x8xf32, #tpu.memory_space<vmem>>, %arg2: memref<128x10xf32, #tpu.memory_space<vmem>>, %arg3: memref<128x1xf32, #tpu.memory_space<vmem>>, %arg4: memref<64x128xf32, #tpu.memory_space<vmem>>, %arg5: memref<64x1xf32, #tpu.memory_space<vmem>>, %arg6: memref<32x64xf32, #tpu.memory_space<vmem>>, %arg7: memref<32x1xf32, #tpu.memory_space<vmem>>, %arg8: memref<32x1xf32, #tpu.memory_space<vmem>>, %arg9: memref<1x1xf32, #tpu.memory_space<smem>>, %arg10: memref<1x8xf32, #tpu.memory_space<vmem>>) attributes {dimension_semantics = [#tpu.dimension_semantics<parallel>], iteration_bounds = array<i64: 1>, scalar_prefetch = 0 : i64, scratch_operands = 0 : i64, tpu.core_type = #tpu.core_type<tc>, window_params = [{transform_indices = @transform_0, window_bounds = array<i64: 10, 8>}, {pipeline_mode = #tpu.pipeline_mode<synchronous>, transform_indices = @transform_1, window_bounds = array<i64: 128, 10>}, {pipeline_mode = #tpu.pipeline_mode<synchronous>, transform_indices = @transform_2, window_bounds = array<i64: 128, 1>}, {pipeline_mode = #tpu.pipeline_mode<synchronous>, transform_indices = @transform_3, window_bounds = array<i64: 64, 128>}, {pipeline_mode = #tpu.pipeline_mode<synchronous>, transform_indices = @transform_4, window_bounds = array<i64: 64, 1>}, {pipeline_mode = #tpu.pipeline_mode<synchronous>, transform_indices = @transform_5, window_bounds = array<i64: 32, 64>}, {pipeline_mode = #tpu.pipeline_mode<synchronous>, transform_indices = @transform_6, window_bounds = array<i64: 32, 1>}, {pipeline_mode = #tpu.pipeline_mode<synchronous>, transform_indices = @transform_7, window_bounds = array<i64: 32, 1>}, {transform_indices = @transform_8, window_bounds = array<i64: 1, 1>}, {transform_indices = @transform_9, window_bounds = array<i64: 1, 8>}]} {
    %c0 = arith.constant 0 : index
    %c0_0 = arith.constant 0 : index
    %0 = vector.load %arg1[%c0, %c0_0] : memref<10x8xf32, #tpu.memory_space<vmem>>, vector<10x8xf32>
    %c0_1 = arith.constant 0 : index
    %c0_2 = arith.constant 0 : index
    %1 = vector.load %arg2[%c0_1, %c0_2] : memref<128x10xf32, #tpu.memory_space<vmem>>, vector<128x10xf32>
    %cst = arith.constant dense<0.000000e+00> : vector<128x8xf32>
    %2 = tpu.matmul %1, %0, %cst {dimension_numbers = #tpu.dot_dimension_numbers<[1], [0], [0], [1], [0, 0, 1, 1], [], []>} : vector<128x10xf32>, vector<10x8xf32>, vector<128x8xf32> -> vector<128x8xf32>
    %c0_3 = arith.constant 0 : index
    %c0_4 = arith.constant 0 : index
    %3 = vector.load %arg3[%c0_3, %c0_4] : memref<128x1xf32, #tpu.memory_space<vmem>>, vector<128x1xf32>
    %4 = vector.broadcast %3 : vector<128x1xf32> to vector<128x8xf32>
    %5 = arith.addf %2, %4 : vector<128x8xf32>
    %cst_5 = arith.constant 0.000000e+00 : f32
    %6 = vector.broadcast %cst_5 : f32 to vector<128x8xf32>
    %7 = arith.maximumf %5, %6 : vector<128x8xf32>
    %c0_6 = arith.constant 0 : index
    %c0_7 = arith.constant 0 : index
    %8 = vector.load %arg4[%c0_6, %c0_7] : memref<64x128xf32, #tpu.memory_space<vmem>>, vector<64x128xf32>
    %cst_8 = arith.constant dense<0.000000e+00> : vector<64x8xf32>
    %9 = tpu.matmul %8, %7, %cst_8 {dimension_numbers = #tpu.dot_dimension_numbers<[1], [0], [0], [1], [0, 0, 1, 1], [], []>} : vector<64x128xf32>, vector<128x8xf32>, vector<64x8xf32> -> vector<64x8xf32>
    %c0_9 = arith.constant 0 : index
    %c0_10 = arith.constant 0 : index
    %10 = vector.load %arg5[%c0_9, %c0_10] : memref<64x1xf32, #tpu.memory_space<vmem>>, vector<64x1xf32>
    %11 = vector.broadcast %10 : vector<64x1xf32> to vector<64x8xf32>
    %12 = arith.addf %9, %11 : vector<64x8xf32>
    %cst_11 = arith.constant 0.000000e+00 : f32
    %13 = vector.broadcast %cst_11 : f32 to vector<64x8xf32>
    %14 = arith.maximumf %12, %13 : vector<64x8xf32>
    %c0_12 = arith.constant 0 : index
    %c0_13 = arith.constant 0 : index
    %15 = vector.load %arg6[%c0_12, %c0_13] : memref<32x64xf32, #tpu.memory_space<vmem>>, vector<32x64xf32>
    %cst_14 = arith.constant dense<0.000000e+00> : vector<32x8xf32>
    %16 = tpu.matmul %15, %14, %cst_14 {dimension_numbers = #tpu.dot_dimension_numbers<[1], [0], [0], [1], [0, 0, 1, 1], [], []>} : vector<32x64xf32>, vector<64x8xf32>, vector<32x8xf32> -> vector<32x8xf32>
    %c0_15 = arith.constant 0 : index
    %c0_16 = arith.constant 0 : index
    %17 = vector.load %arg7[%c0_15, %c0_16] : memref<32x1xf32, #tpu.memory_space<vmem>>, vector<32x1xf32>
    %18 = vector.broadcast %17 : vector<32x1xf32> to vector<32x8xf32>
    %19 = arith.addf %16, %18 : vector<32x8xf32>
    %cst_17 = arith.constant 0.000000e+00 : f32
    %20 = vector.broadcast %cst_17 : f32 to vector<32x8xf32>
    %21 = arith.maximumf %19, %20 : vector<32x8xf32>
    %c0_18 = arith.constant 0 : index
    %c0_19 = arith.constant 0 : index
    %22 = vector.load %arg8[%c0_18, %c0_19] : memref<32x1xf32, #tpu.memory_space<vmem>>, vector<32x1xf32>
    %23 = vector.broadcast %22 : vector<32x1xf32> to vector<32x8xf32>
    %24 = arith.mulf %21, %23 : vector<32x8xf32>
    %cst_20 = arith.constant dense<0.000000e+00> : vector<8xf32>
    %25 = vector.multi_reduction <add>, %24, %cst_20 [0] : vector<32x8xf32> to vector<8xf32>
    %26 = vector.shape_cast %25 : vector<8xf32> to vector<1x8xf32>
    %c0_21 = arith.constant 0 : index
    %c0_22 = arith.constant 0 : index
    %27 = memref.load %arg9[%c0_21, %c0_22] : memref<1x1xf32, #tpu.memory_space<smem>>
    %28 = vector.broadcast %27 : f32 to vector<1x8xf32>
    %29 = arith.addf %26, %28 : vector<1x8xf32>
    %c0_23 = arith.constant 0 : index
    %c0_24 = arith.constant 0 : index
    %30 = vector.load %arg10[%c0_23, %c0_24] : memref<1x8xf32, #tpu.memory_space<vmem>>, vector<1x8xf32>
    tpu.vector_store %arg10[%c0_23, %c0_24], %29 {strides = array<i32>} : memref<1x8xf32, #tpu.memory_space<vmem>>, vector<1x8xf32>,
    return
  }
  func.func @transform_0(%arg0: i32) -> (i32, i32) {
    %c0_i32 = arith.constant 0 : i32
    %c0_i32_0 = arith.constant 0 : i32
    return %c0_i32, %arg0 : i32, i32
  }
  func.func @transform_1(%arg0: i32) -> (i32, i32) {
    %c0_i32 = arith.constant 0 : i32
    %c0_i32_0 = arith.constant 0 : i32
    %c0_i32_1 = arith.constant 0 : i32
    return %c0_i32, %c0_i32_0 : i32, i32
  }
  func.func @transform_2(%arg0: i32) -> (i32, i32) {
    %c0_i32 = arith.constant 0 : i32
    %c0_i32_0 = arith.constant 0 : i32
    %c0_i32_1 = arith.constant 0 : i32
    return %c0_i32, %c0_i32_0 : i32, i32
  }
  func.func @transform_3(%arg0: i32) -> (i32, i32) {
    %c0_i32 = arith.constant 0 : i32
    %c0_i32_0 = arith.constant 0 : i32
    %c0_i32_1 = arith.constant 0 : i32
    return %c0_i32, %c0_i32_0 : i32, i32
  }
  func.func @transform_4(%arg0: i32) -> (i32, i32) {
    %c0_i32 = arith.constant 0 : i32
    %c0_i32_0 = arith.constant 0 : i32
    %c0_i32_1 = arith.constant 0 : i32
    return %c0_i32, %c0_i32_0 : i32, i32
  }
  func.func @transform_5(%arg0: i32) -> (i32, i32) {
    %c0_i32 = arith.constant 0 : i32
    %c0_i32_0 = arith.constant 0 : i32
    %c0_i32_1 = arith.constant 0 : i32
    return %c0_i32, %c0_i32_0 : i32, i32
  }
  func.func @transform_6(%arg0: i32) -> (i32, i32) {
    %c0_i32 = arith.constant 0 : i32
    %c0_i32_0 = arith.constant 0 : i32
    %c0_i32_1 = arith.constant 0 : i32
    return %c0_i32, %c0_i32_0 : i32, i32
  }
  func.func @transform_7(%arg0: i32) -> (i32, i32) {
    %c0_i32 = arith.constant 0 : i32
    %c0_i32_0 = arith.constant 0 : i32
    %c0_i32_1 = arith.constant 0 : i32
    return %c0_i32, %c0_i32_0 : i32, i32
  }
  func.func @transform_8(%arg0: i32) -> (i32, i32) {
    %c0_i32 = arith.constant 0 : i32
    %c0_i32_0 = arith.constant 0 : i32
    %c0_i32_1 = arith.constant 0 : i32
    return %c0_i32, %c0_i32_0 : i32, i32
  }
  func.func @transform_9(%arg0: i32) -> (i32, i32) {
    %c0_i32 = arith.constant 0 : i32
    %c0_i32_0 = arith.constant 0 : i32
    return %c0_i32, %arg0 : i32, i32
  }
}

</mosaic_0001>

<bundles_post_ra>
// kernel: tpu_custom_call.1
= control target key start
LH: loop header
LB: loop body
LE: loop exit
PB: predicated region body
PF: predicated region fallthrough
CT: control target
= control target key end

     0   :  { %vm197_vm0 = vcmask 1041408   ;;  %v594_v3 = vmov 0   ;;  %vm148_vm1 = vcmask 80896   ;;  %s866_s0 = inlined_call_operand.vmem [shape: f32[10,8], index: 0, kind: input, shape index: {}]   ;;  %s867_s1 = inlined_call_operand.vmem [shape: f32[128,10], index: 1, kind: input, shape index: {}]   ;;  %s868_s2 = inlined_call_operand.vmem [shape: f32[128,1], index: 2, kind: input, shape index: {}]   ;;  %s869_s3 = inlined_call_operand.vmem [shape: f32[64,128], index: 3, kind: input, shape index: {}]   ;;  %s870_s4 = inlined_call_operand.vmem [shape: f32[64,1], index: 4, kind: input, shape index: {}]   ;;  %s871_s5 = inlined_call_operand.vmem [shape: f32[32,64], index: 5, kind: input, shape index: {}]   ;;  %s872_s6 = inlined_call_operand.vmem [shape: f32[32,1], index: 6, kind: input, shape index: {}]   ;;  %s873_s7 = inlined_call_operand.vmem [shape: f32[32,1], index: 7, kind: input, shape index: {}]   ;;  %s874_s8 = inlined_call_operand.<no memory space> [shape: f32[1,1], index: 8, kind: input, shape index: {}]   ;;  %s875_s9 = inlined_call_operand.hbm [shape: f32[1,8], index: 9, kind: output, shape index: {}]  }
   0x1   :  { %v35_v0 = vld [vmem:[%s866_s0 + $0x8] sm:$0x3]  ;;  %v67_v1 = vld [vmem:[%s868_s2 + $0x78] sm:$0xff]  ;;  %566 = vset.pattern.permute.xlu1 %v594_v3  ;;  %565 = vset.pattern.permute.xlu0 %v594_v3  ;;  %v34_v4 = vld [vmem:[%s866_s0] sm:$0xff] }
   0x2   :  { %v65_v2 = vld [vmem:[%s868_s2 + $0x68] sm:$0xff]  ;;  %524 = vmatpush.msk.msra.mxu0 %vm197_vm0, %v35_v0  ;;  %545 = vmatpush.msk.msra.mxu3 %vm197_vm0, %v35_v0  ;;  %v36_v5 = vld [vmem:[%s867_s1] sm:$0xff]  ;;  %v63_v7 = vld [vmem:[%s868_s2 + $0x58] sm:$0xff] }
   0x3   :  { %v45_v6 = vld [vmem:[%s867_s1 + $0x48] sm:$0xff]  ;;  %145 = vperm.xlu0 %565, %v67_v1   ;;  %135 = vperm.xlu1 %566, %v65_v2   ;;  %v66_v8 = vld [vmem:[%s868_s2 + $0x70] sm:$0xff]  ;;  %v64_v9 = vld [vmem:[%s868_s2 + $0x60] sm:$0xff] }
   0x4   :  { %216 = vmatpush.msra.mxu0 %v34_v4  ;;  %546 = vmatpush.msra.mxu3 %v34_v4 }
   0x5   :  { %525 = vmatmul.msk.f32.vlgmr.msra.gmra.mxu0 %vm148_vm1, %v36_v5  ;;  %534 = vmatmul.msk.f32.vlgmr.msra.gmra.mxu3 %vm148_vm1, %v45_v6 }
   0x6   :  { %567 = vset.pattern.permute.xlu2 %v594_v3 }
   0x7   :  { %125 = vperm.xlu2 %567, %v63_v7  }
   0x8   :  { %15 = vsyncpa [#allocation4], 0  ;;  %v37_v10 = vld [vmem:[%s867_s1 + $0x8] sm:$0xff]  ;;  %v46_v11 = vld [vmem:[%s867_s1 + $0x50] sm:$0xff]  ;;  %vm415_vm2 = vcmask 523264   ;;  %vm489_vm3 = vcmask 64512  }
   0x9   :  { %v62_v12 = vld [vmem:[%s868_s2 + $0x50] sm:$0xff]  ;;  %v61_v13 = vld [vmem:[%s868_s2 + $0x48] sm:$0xff]  ;;  %v60_v14 = vld [vmem:[%s868_s2 + $0x40] sm:$0xff]  ;;  %s595_s14 = smov [#allocation3]   ;;  %vm506_vm4 = vcmask 57344  }
   0xa   :  { %v38_v15 = vld [vmem:[%s867_s1 + $0x10] sm:$0xff]  ;;  %v47_v16 = vld [vmem:[%s867_s1 + $0x58] sm:$0xff]  ;;  %v57_v19 = vld [vmem:[%s868_s2 + $0x28] sm:$0xff]  ;;  %s513_s15 = sshll.u32 %s595_s14, 4  ;;  %s514_s15 = int_to_ptr.vmem [resolvable:$true] %s513_s15 }
   0xb   :  { %140 = vperm.xlu0 %565, %v66_v8   ;;  %130 = vperm.xlu1 %566, %v64_v9   ;;  %v59_v17 = vld [vmem:[%s868_s2 + $0x38] sm:$0xff]  ;;  %v58_v18 = vld [vmem:[%s868_s2 + $0x30] sm:$0xff]  ;;  %v48_v21 = vld [vmem:[%s867_s1 + $0x60] sm:$0xff] }
   0xc   :  { %v39_v20 = vld [vmem:[%s867_s1 + $0x18] sm:$0xff]  ;;  %v56_v22 = vld [vmem:[%s868_s2 + $0x20] sm:$0xff]  ;;  %v54_v24 = vld [vmem:[%s868_s2 + $0x10] sm:$0xff] }
   0xd   :  { %526 = vmatmul.msk.f32.gmra.mxu0 %vm148_vm1, %v37_v10  ;;  %535 = vmatmul.msk.f32.gmra.mxu3 %vm148_vm1, %v46_v11  ;;  %v55_v23 = vld [vmem:[%s868_s2 + $0x18] sm:$0xff]  ;;  %v40_v25 = vld [vmem:[%s867_s1 + $0x20] sm:$0xff]  ;;  %v49_v26 = vld [vmem:[%s867_s1 + $0x68] sm:$0xff] }
   0xe   :  { %v53_v27 = vld [vmem:[%s868_s2 + $0x8] sm:$0xff]  ;;  %v297_v28 = vld [vmem:[%s870_s4 + $0x38] sm:$0xff]  ;;  %v52_v29 = vld [vmem:[%s868_s2] sm:$0xff] }
   0xf   :  { %120 = vperm.xlu2 %567, %v62_v12   ;;  %v41_v30 = vld [vmem:[%s867_s1 + $0x28] sm:$0xff]  ;;  %v50_v31 = vld [vmem:[%s867_s1 + $0x70] sm:$0xff]  ;;  %v294_v33 = vld [vmem:[%s870_s4 + $0x20] sm:$0xff] }
  0x10   :  { %v296_v32 = vld [vmem:[%s870_s4 + $0x30] sm:$0xff]  ;;  %v295_v34 = vld [vmem:[%s870_s4 + $0x28] sm:$0xff]  ;;  %v51_v36 = vld [vmem:[%s867_s1 + $0x78] sm:$0xff] }
  0x11   :  { %v42_v35 = vld [vmem:[%s867_s1 + $0x30] sm:$0xff]  ;;  %v293_v37 = vld [vmem:[%s870_s4 + $0x18] sm:$0xff]  ;;  %v291_v38 = vld [vmem:[%s870_s4 + $0x8] sm:$0xff] }
  0x12   :  { %v292_v39 = vld [vmem:[%s870_s4 + $0x10] sm:$0xff]  ;;  %v43_v40 = vld [vmem:[%s867_s1 + $0x38] sm:$0xff]  ;;  %v290_v41 = vld [vmem:[%s870_s4] sm:$0xff] }
  0x13   :  { %115 = vperm.xlu0 %565, %v61_v13   ;;  %110 = vperm.xlu1 %566, %v60_v14   ;;  %v392_v42 = vld [vmem:[%s872_s6 + $0x8] sm:$0xff]  ;;  %v391_v43 = vld [vmem:[%s872_s6] sm:$0xff]  ;;  %v393_v45 = vld [vmem:[%s872_s6 + $0x10] sm:$0xff] }
  0x14   :  { %v44_v44 = vld [vmem:[%s867_s1 + $0x40] sm:$0xff]  ;;  %v394_v47 = vld [vmem:[%s872_s6 + $0x18] sm:$0xff]  ;;  %v462_v48 = vld [vmem:[%s873_s7 + $0x8] sm:$0xff] }
  0x15   :  { %527 = vmatmul.msk.f32.gmra.mxu0 %vm148_vm1, %v38_v15  ;;  %536 = vmatmul.msk.f32.gmra.mxu3 %vm148_vm1, %v47_v16  ;;  %v461_v46 = vld [vmem:[%s873_s7] sm:$0xff]  ;;  %v464_v49 = vld [vmem:[%s873_s7 + $0x18] sm:$0xff]  ;;  %v463_v50 = vld [vmem:[%s873_s7 + $0x10] sm:$0xff]  ;;  %s515_s7 = sshll.u32 %s875_s9, 4  ;;  %s516_s7 = int_to_ptr.hbm [resolvable:$true] %s515_s7 }
  0x17   :  { %105 = vperm.xlu2 %567, %v59_v17  }
  0x1b   :  { %100 = vperm.xlu0 %565, %v58_v18   ;;  %95 = vperm.xlu1 %566, %v57_v19  }
  0x1d   :  { %528 = vmatmul.msk.f32.gmra.mxu0 %vm148_vm1, %v39_v20  ;;  %537 = vmatmul.msk.f32.gmra.mxu3 %vm148_vm1, %v48_v21 }
  0x1f   :  { %90 = vperm.xlu2 %567, %v56_v22  }
  0x23   :  { %85 = vperm.xlu0 %565, %v55_v23   ;;  %80 = vperm.xlu1 %566, %v54_v24  }
  0x25   :  { %529 = vmatmul.msk.f32.gmra.mxu0 %vm148_vm1, %v40_v25  ;;  %538 = vmatmul.msk.f32.gmra.mxu3 %vm148_vm1, %v49_v26 }
  0x27   :  { %75 = vperm.xlu2 %567, %v53_v27  }
  0x2b   :  { %335 = vperm.xlu1 %566, %v297_v28   ;;  %70 = vperm.xlu0 %565, %v52_v29  }
  0x2d   :  { %530 = vmatmul.msk.f32.gmra.mxu0 %vm148_vm1, %v41_v30  ;;  %539 = vmatmul.msk.f32.gmra.mxu3 %vm148_vm1, %v50_v31 }
  0x2f   :  { %330 = vperm.xlu2 %567, %v296_v32  }
  0x33   :  { %320 = vperm.xlu1 %566, %v294_v33   ;;  %325 = vperm.xlu0 %565, %v295_v34  }
  0x35   :  { %531 = vmatmul.msk.f32.gmra.mxu0 %vm148_vm1, %v42_v35  ;;  %540 = vmatmul.msk.f32.gmra.mxu3 %vm148_vm1, %v51_v36 }
  0x37   :  { %315 = vperm.xlu2 %567, %v293_v37  }
  0x3b   :  { %305 = vperm.xlu1 %566, %v291_v38   ;;  %310 = vperm.xlu0 %565, %v292_v39  }
  0x3d   :  { %532 = vmatmul.msk.f32.gmra.mxu0 %vm148_vm1, %v43_v40 }
  0x3f   :  { %300 = vperm.xlu2 %567, %v290_v41  }
  0x43   :  { %402 = vperm.xlu1 %566, %v392_v42   ;;  %397 = vperm.xlu0 %565, %v391_v43  }
  0x45   :  { %533 = vmatmul.msk.f32.gmra.mxu0 %vm148_vm1, %v44_v44 }
  0x47   :  { %407 = vperm.xlu2 %567, %v393_v45  }
  0x4b   :  { %467 = vperm.xlu1 %566, %v461_v46   ;;  %412 = vperm.xlu0 %565, %v394_v47  }
  0x4f   :  { %472 = vperm.xlu2 %567, %v462_v48  }
  0x53   :  { %482 = vperm.xlu1 %566, %v464_v49   ;;  %477 = vperm.xlu0 %565, %v463_v50  }
  0x61   :  { %v126_v63 = vpop.permute.xlu2 %125 }
  0x69   :  { %v121_v5 = vpop.permute.xlu2 %120 }
  0x71   :  { %v106_v16 = vpop.permute.xlu2 %105 }
  0x75   :  { %v146_v58 = vpop.permute.xlu0 %145  ;;  %v136_v61 = vpop.permute.xlu1 %135 }
  0x79   :  { %v91_v30 = vpop.permute.xlu2 %90 }
  0x7d   :  { %v141_v0 = vpop.permute.xlu0 %140  ;;  %v131_v2 = vpop.permute.xlu1 %130 }
  0x81   :  { %v76_v43 = vpop.permute.xlu2 %75 }
  0x82   :  { %v812_v51 = vpop.f32.mrf.mxu0 }
  0x85   :  { %v116_v6 = vpop.permute.xlu0 %115  ;;  %v111_v10 = vpop.permute.xlu1 %110 }
  0x88   :  { %v245_v52 = vpop.f32.mrf.mxu3 }
  0x89   :  { %v246_v23 = vadd.f32 %v245_v52, %v116_v6  ;;  %v282_v52 = vld [vmem:[%s869_s3] sm:$0xff] }
  0x8a   :  { %v814_v53 = vpop.f32.mrf.mxu0 }
  0x8b   :  { %v275_v28 = vmax.f32 %v246_v23, 0.0  ;;  %v222_v45 = vadd.f32 %v814_v53, %v76_v43  ;;  %v288_v53 = vld [vmem:[%s869_s3 + $0x30] sm:$0xff] }
  0x8d   :  { %v101_v17 = vpop.permute.xlu0 %100  ;;  %v96_v25 = vpop.permute.xlu1 %95  ;;  %v267_v49 = vmax.f32 %v222_v45, 0.0 }
  0x90   :  { %v248_v54 = vpop.f32.mrf.mxu3 }
  0x91   :  { %v249_v20 = vadd.f32 %v248_v54, %v121_v5  ;;  %v289_v54 = vld [vmem:[%s869_s3 + $0x38] sm:$0xff] }
  0x92   :  { %v816_v55 = vpop.f32.mrf.mxu0 }
  0x93   :  { %v276_v26 = vmax.f32 %v249_v20, 0.0 }
  0x95   :  { %v86_v31 = vpop.permute.xlu0 %85  ;;  %v81_v38 = vpop.permute.xlu1 %80 }
  0x96   :  { %v225_v41 = vadd.f32 %v816_v55, %v81_v38  ;;  %v284_v55 = vld [vmem:[%s869_s3 + $0x10] sm:$0xff] }
  0x98   :  { %v251_v56 = vpop.f32.mrf.mxu3  ;;  %v268_v47 = vmax.f32 %v225_v41, 0.0 }
  0x99   :  { %v252_v18 = vadd.f32 %v251_v56, %v126_v63  ;;  %v285_v56 = vld [vmem:[%s869_s3 + $0x18] sm:$0xff] }
  0x9a   :  { %v818_v57 = vpop.f32.mrf.mxu0 }
  0x9b   :  { %v277_v24 = vmax.f32 %v252_v18, 0.0  ;;  %v228_v39 = vadd.f32 %v818_v57, %v86_v31  ;;  %v286_v57 = vld [vmem:[%s869_s3 + $0x20] sm:$0xff] }
  0x9d   :  { %v71_v44 = vpop.permute.xlu0 %70  ;;  %v269_v46 = vmax.f32 %v228_v39, 0.0  ;;  %v336_v63 = vpop.permute.xlu1 %335 }
  0x9e   :  { %v219_v48 = vadd.f32 %v812_v51, %v71_v44  ;;  %v283_v51 = vld [vmem:[%s869_s3 + $0x8] sm:$0xff] }
  0xa0   :  { %v254_v59 = vpop.f32.mrf.mxu3  ;;  %v266_v50 = vmax.f32 %v219_v48, 0.0 }
  0xa1   :  { %v255_v14 = vadd.f32 %v254_v59, %v131_v2 }
  0xa2   :  { %v230_v60 = vpop.f32.mrf.mxu0 }
  0xa3   :  { %v278_v21 = vmax.f32 %v255_v14, 0.0  ;;  %v231_v36 = vadd.f32 %v230_v60, %v91_v30  ;;  %v390_v30 = vld [vmem:[%s871_s5 + $0x18] sm:$0xff] }
  0xa5   :  { %v270_v42 = vmax.f32 %v231_v36, 0.0 }
  0xa8   :  { %v257_v62 = vpop.f32.mrf.mxu3 }
  0xa9   :  { %v258_v12 = vadd.f32 %v257_v62, %v136_v61  ;;  %v331_v62 = vpop.permute.xlu2 %330 }
  0xaa   :  { %v233_v1 = vpop.f32.mrf.mxu0 }
  0xab   :  { %v279_v19 = vmax.f32 %v258_v12, 0.0  ;;  %v234_v34 = vadd.f32 %v233_v1, %v96_v25 }
  0xad   :  { %v271_v40 = vmax.f32 %v234_v34, 0.0 }
  0xb0   :  { %v260_v3 = vpop.f32.mrf.mxu3 }
  0xb1   :  { %v261_v8 = vadd.f32 %v260_v3, %v141_v0 }
  0xb2   :  { %v236_v4 = vpop.f32.mrf.mxu0 }
  0xb3   :  { %v280_v15 = vmax.f32 %v261_v8, 0.0  ;;  %v237_v32 = vadd.f32 %v236_v4, %v101_v17  ;;  %v326_v8 = vpop.permute.xlu0 %325 }
  0xb5   :  { %v272_v37 = vmax.f32 %v237_v32, 0.0 }
  0xb8   :  { %v263_v7 = vpop.f32.mrf.mxu3 }
  0xb9   :  { %v264_v9 = vadd.f32 %v263_v7, %v146_v58  ;;  %v287_v58 = vld [vmem:[%s869_s3 + $0x28] sm:$0xff] }
  0xba   :  { %v239_v11 = vpop.f32.mrf.mxu0 }
  0xbb   :  { %v281_v13 = vmax.f32 %v264_v9, 0.0  ;;  %v240_v29 = vadd.f32 %v239_v11, %v106_v16  ;;  %v321_v9 = vpop.permute.xlu1 %320  ;;  %v311_v16 = vpop.permute.xlu0 %310 }
  0xbd   :  { %338 = vmatpush.msra.mxu1 %v281_v13  ;;  %547 = vmatpush.msra.mxu2 %v281_v13  ;;  %v273_v35 = vmax.f32 %v240_v29, 0.0  ;;  %v389_v29 = vld [vmem:[%s871_s5 + $0x10] sm:$0xff] }
  0xbf   :  { %339 = vmatpush.msra.mxu1 %v280_v15  ;;  %548 = vmatpush.msra.mxu2 %v280_v15 }
  0xc1   :  { %340 = vmatpush.msra.mxu1 %v279_v19  ;;  %549 = vmatpush.msra.mxu2 %v279_v19 }
  0xc2   :  { %v242_v22 = vpop.f32.mrf.mxu0 }
  0xc3   :  { %341 = vmatpush.msra.mxu1 %v278_v21  ;;  %550 = vmatpush.msra.mxu2 %v278_v21  ;;  %v243_v27 = vadd.f32 %v242_v22, %v111_v10  ;;  %v316_v10 = vpop.permute.xlu2 %315  ;;  %v306_v19 = vpop.permute.xlu1 %305 }
  0xc4   :  { %v398_v32 = vpop.permute.xlu0 %397 }
  0xc5   :  { %342 = vmatpush.msra.mxu1 %v277_v24  ;;  %551 = vmatpush.msra.mxu2 %v277_v24  ;;  %v274_v33 = vmax.f32 %v243_v27, 0.0  ;;  %v387_v27 = vld [vmem:[%s871_s5] sm:$0xff] }
  0xc7   :  { %343 = vmatpush.msra.mxu1 %v276_v26  ;;  %552 = vmatpush.msra.mxu2 %v276_v26 }
  0xc9   :  { %344 = vmatpush.msra.mxu1 %v275_v28  ;;  %553 = vmatpush.msra.mxu2 %v275_v28  ;;  %v388_v28 = vld [vmem:[%s871_s5 + $0x8] sm:$0xff] }
  0xcb   :  { %345 = vmatpush.msra.mxu1 %v274_v33  ;;  %554 = vmatpush.msra.mxu2 %v274_v33  ;;  %v301_v22 = vpop.permute.xlu2 %300  ;;  %v403_v33 = vpop.permute.xlu1 %402 }
  0xcc   :  { %v413_v36 = vpop.permute.xlu0 %412 }
  0xcd   :  { %346 = vmatpush.msra.mxu1 %v273_v35  ;;  %555 = vmatpush.msra.mxu2 %v273_v35 }
  0xcf   :  { %347 = vmatpush.msra.mxu1 %v272_v37  ;;  %556 = vmatpush.msra.mxu2 %v272_v37 }
  0xd1   :  { %348 = vmatpush.msra.mxu1 %v271_v40  ;;  %557 = vmatpush.msra.mxu2 %v271_v40 }
  0xd3   :  { %349 = vmatpush.msra.mxu1 %v270_v42  ;;  %558 = vmatpush.msra.mxu2 %v270_v42  ;;  %v408_v35 = vpop.permute.xlu2 %407  ;;  %v468_v42 = vpop.permute.xlu1 %467 }
  0xd5   :  { %350 = vmatpush.msra.mxu1 %v269_v46  ;;  %559 = vmatpush.msra.mxu2 %v269_v46 }
  0xd7   :  { %351 = vmatpush.msra.mxu1 %v268_v47  ;;  %560 = vmatpush.msra.mxu2 %v268_v47  ;;  %v478_v47 = vpop.permute.xlu0 %477 }
  0xd9   :  { %352 = vmatpush.msra.mxu1 %v267_v49  ;;  %561 = vmatpush.msra.mxu2 %v267_v49 }
  0xdb   :  { %353 = vmatpush.msra.mxu1 %v266_v50  ;;  %562 = vmatpush.msra.mxu2 %v266_v50  ;;  %v473_v45 = vpop.permute.xlu2 %472 }
  0xdc   :  { %354 = vmatmul.f32.vlgmr.msra.gmra.mxu1 %v282_v52  ;;  %372 = vmatmul.f32.vlgmr.msra.gmra.mxu2 %v288_v53 }
  0xe4   :  { %357 = vmatmul.f32.gmra.mxu1 %v283_v51  ;;  %375 = vmatmul.f32.gmra.mxu2 %v289_v54 }
  0xec   :  { %360 = vmatmul.f32.gmra.mxu1 %v284_v55 }
  0xf4   :  { %363 = vmatmul.f32.gmra.mxu1 %v285_v56  ;;  %v483_v56 = vpop.permute.xlu1 %482 }
  0xfc   :  { %366 = vmatmul.f32.gmra.mxu1 %v286_v57 }
 0x104   :  { %369 = vmatmul.f32.gmra.mxu1 %v287_v58 }
 0x159   :  { %v355_v59 = vpop.f32.mrf.mxu1 }
 0x15a   :  { %v356_v23 = vadd.f32 %v355_v59, %v301_v22 }
 0x15c   :  { %v379_v26 = vmax.f32 %v356_v23, 0.0 }
 0x15f   :  { %v373_v60 = vpop.f32.mrf.mxu2 }
 0x160   :  { %v374_v1 = vadd.f32 %v373_v60, %v331_v62 }
 0x161   :  { %v358_v61 = vpop.f32.mrf.mxu1 }
 0x162   :  { %v385_v5 = vmax.f32 %v374_v1, 0.0  ;;  %v359_v20 = vadd.f32 %v358_v61, %v306_v19 }
 0x164   :  { %v380_v25 = vmax.f32 %v359_v20, 0.0 }
 0x167   :  { %v376_v0 = vpop.f32.mrf.mxu2 }
 0x168   :  { %v377_v2 = vadd.f32 %v376_v0, %v336_v63 }
 0x169   :  { %v361_v3 = vpop.f32.mrf.mxu1 }
 0x16a   :  { %v386_v4 = vmax.f32 %v377_v2, 0.0  ;;  %v362_v17 = vadd.f32 %v361_v3, %v311_v16  ;;  %v504_v3 = vstv %s874_s8 }
 0x16c   :  { %436 = vmatpush.msrb.mxu2 %v386_v4  ;;  %v381_v24 = vmax.f32 %v362_v17, 0.0 }
 0x16e   :  { %437 = vmatpush.msrb.mxu2 %v385_v5 }
 0x171   :  { %v364_v6 = vpop.f32.mrf.mxu1 }
 0x172   :  { %v365_v14 = vadd.f32 %v364_v6, %v316_v10 }
 0x174   :  { %v382_v21 = vmax.f32 %v365_v14, 0.0 }
 0x179   :  { %v367_v7 = vpop.f32.mrf.mxu1 }
 0x17a   :  { %v368_v12 = vadd.f32 %v367_v7, %v321_v9 }
 0x17c   :  { %v383_v18 = vmax.f32 %v368_v12, 0.0 }
 0x181   :  { %v370_v11 = vpop.f32.mrf.mxu1 }
 0x182   :  { %v371_v13 = vadd.f32 %v370_v11, %v326_v8 }
 0x184   :  { %v384_v15 = vmax.f32 %v371_v13, 0.0 }
 0x186   :  { %438 = vmatpush.msrb.mxu2 %v384_v15 }
 0x188   :  { %439 = vmatpush.msrb.mxu2 %v383_v18 }
 0x18a   :  { %440 = vmatpush.msrb.mxu2 %v382_v21 }
 0x18c   :  { %441 = vmatpush.msrb.mxu2 %v381_v24 }
 0x18e   :  { %442 = vmatpush.msrb.mxu2 %v380_v25 }
 0x190   :  { %443 = vmatpush.msrb.mxu2 %v379_v26 }
 0x191   :  { %541 = vmatmul.msk.f32.vlgmr.msrb.gmra.mxu2 %vm415_vm2, %v387_v27 }
 0x199   :  { %542 = vmatmul.msk.f32.gmra.mxu2 %vm415_vm2, %v388_v28 }
 0x1a1   :  { %543 = vmatmul.msk.f32.gmra.mxu2 %vm415_vm2, %v389_v29 }
 0x1a9   :  { %544 = vmatmul.msk.f32.gmra.mxu2 %vm415_vm2, %v390_v30 }
 0x214   :  { %v445_v31 = vpop.f32.mrf.mxu2 }
 0x215   :  { %v446_v38 = vadd.f32 %v445_v31, %v398_v32 }
 0x217   :  { %v457_v43 = vmax.f32 %v446_v38, 0.0 }
 0x219   :  { %v485_v48 = vmul.f32 %v468_v42, %v457_v43 }
 0x21b   :  { %v490_v51 = vsel %vm489_vm3, %v485_v48, 0.0 }
 0x21c   :  { %v448_v34 = vpop.f32.mrf.mxu2 }
 0x21d   :  { %v449_v37 = vadd.f32 %v448_v34, %v403_v33 }
 0x21f   :  { %v458_v40 = vmax.f32 %v449_v37, 0.0 }
 0x221   :  { %v486_v46 = vmul.f32 %v473_v45, %v458_v40 }
 0x223   :  { %v491_v52 = vsel %vm489_vm3, %v486_v46, 0.0 }
 0x224   :  { %v451_v39 = vpop.f32.mrf.mxu2  ;;  %v492_v57 = vadd.f32 %v491_v52, %v490_v51 }
 0x225   :  { %v452_v41 = vadd.f32 %v451_v39, %v408_v35 }
 0x227   :  { %v459_v44 = vmax.f32 %v452_v41, 0.0 }
 0x229   :  { %v487_v49 = vmul.f32 %v478_v47, %v459_v44 }
 0x22b   :  { %v493_v54 = vsel %vm489_vm3, %v487_v49, 0.0 }
 0x22c   :  { %v454_v50 = vpop.f32.mrf.mxu2  ;;  %v494_v59 = vadd.f32 %v493_v54, %v492_v57 }
 0x22d   :  { %v455_v53 = vadd.f32 %v454_v50, %v413_v36 }
 0x22f   :  { %v460_v55 = vmax.f32 %v455_v53, 0.0 }
 0x231   :  { %v488_v58 = vmul.f32 %v483_v56, %v460_v55 }
 0x233   :  { %v495_v60 = vsel %vm489_vm3, %v488_v58, 0.0 }
 0x234   :  { %v496_v61 = vadd.f32 %v495_v60, %v494_v59 }
 0x236   :  { %v497_v62 = vrot.slane %v496_v61, 4 }
 0x238   :  { %v498_v63 = vadd.f32 %v497_v62, %v496_v61 }
 0x23a   :  { %v499_v0 = vrot.slane %v498_v63, 2 }
 0x23c   :  { %v500_v1 = vadd.f32 %v499_v0, %v498_v63 }
 0x23e   :  { %v501_v2 = vrot.slane %v500_v1, 1 }
 0x240   :  { %v502_v4 = vadd.f32 %v501_v2, %v500_v1 }
 0x242   :  { %v505_v5 = vadd.f32 %v504_v3, %v502_v4 }
 0x244   :  { %507 = vst.msk [vmem:[#allocation3] sm:$0x1] %vm506_vm4, %v505_v5 }
 0x245   :  { %518 = dma.vmem_to_hbm [thread:$0]  %s514_s15, 16, %s516_s7, [#allocation4]  }
 0x246   :  { %592 = dma.done.wait [#allocation4], 16  }
 0x247   :  { %593 = vsyncadd [#allocation4], 4294967280 }
 0x248   :  { %523 = vsyncpa [#allocation4], 1 }

</bundles_post_ra>
